<compile_context>
chip_gen: v6e
topology: v6e:2x2x1
jax: 0.10.0
libtpu: 0.0.40
codegen_flags: <defaults>
</compile_context>

<pallas_src>
import functools
import math

import jax
import jax.numpy as jnp
from jax.experimental import pallas as pl
from jax.experimental.pallas import tpu as pltpu


def _round_up(x: int, m: int) -> int:
    return ((x + m - 1) // m) * m


def _linear_kernel(x_ref, wt_ref, b_ref, o_ref):
    # MXU matmul in bf16 with f32 accumulation; bias add in f32; store lane-dense.
    x = x_ref[...].astype(wt_ref.dtype)
    acc = jnp.dot(x, wt_ref[...], preferred_element_type=jnp.float32)
    o_ref[...] = (acc + b_ref[...]).astype(o_ref.dtype)


def prepare_encoder_params(weight, bias, *, compute_dtype=jnp.bfloat16, lane=128):
    """One-time prep outside the forward: transpose, pad F_out to a lane multiple, cast.

    weight: (F_out, F_in) torch convention; bias: (F_out,)
    Returns (wt_padded (F_in, F_out_pad) compute_dtype, bias_padded (1, F_out_pad) f32, f_out).
    """
    f_out, f_in = weight.shape
    f_out_pad = _round_up(f_out, lane)
    wt = jnp.zeros((f_in, f_out_pad), compute_dtype)
    wt = wt.at[:, :f_out].set(weight.T.astype(compute_dtype))
    b2 = jnp.zeros((1, f_out_pad), jnp.float32)
    b2 = b2.at[:, :f_out].set(bias.astype(jnp.float32).reshape(1, f_out))
    return wt, b2, f_out


@functools.partial(jax.jit, static_argnames=("f_out", "tile_b_max", "tile_n_max"))
def encoder_forward(x, wt, b2, *, f_out, tile_b_max=512, tile_n_max=512):
    """x: (B, F_in); wt: (F_in, F_out_pad) prepared; b2: (1, F_out_pad) prepared."""
    B, f_in = x.shape
    f_in_w, f_out_pad = wt.shape
    assert f_in == f_in_w, "feature mismatch between x and prepared weight"

    # --- batch tiling: big tiles for DMA throughput, padded grid, >=2 blocks when possible
    b8 = _round_up(B, 8)
    tile_b = min(tile_b_max, b8)
    if b8 == tile_b and b8 >= 16:
        # split so dual-TensorCore chips (v7x) get at least 2 parallel blocks
        tile_b = _round_up(-(-b8 // 2), 8)
    b_pad = _round_up(B, tile_b)
    if b_pad != B:
        x = jnp.pad(x, ((0, b_pad - B), (0, 0)))

    # --- output-feature tiling keeps the resident weight block VMEM-bounded
    tile_n = min(tile_n_max, f_out_pad)
    assert f_out_pad % tile_n == 0

    nb, nn = b_pad // tile_b, f_out_pad // tile_n

    # rough double-buffered VMEM footprint; raise scoped limit only when needed
    xb = jnp.dtype(x.dtype).itemsize
    wb = jnp.dtype(wt.dtype).itemsize
    vmem_bytes = (2 * tile_b * f_in * xb        # x tiles (double-buffered)
                  + 2 * f_in * tile_n * wb      # weight tile
                  + 2 * tile_n * 4              # bias tile
                  + 2 * tile_b * tile_n * xb)   # output tiles
    vmem_limit = None if vmem_bytes < (16 << 20) else min(vmem_bytes + (4 << 20), 48 << 20)

    y_pad = pl.pallas_call(
        _linear_kernel,
        out_shape=jax.ShapeDtypeStruct((b_pad, f_out_pad), x.dtype),
        grid_spec=pltpu.PrefetchScalarGridSpec(
            num_scalar_prefetch=0,
            grid=(nb, nn),
            in_specs=[
                pl.BlockSpec((tile_b, f_in), lambda i, j: (i, 0)),
                pl.BlockSpec((f_in, tile_n), lambda i, j: (0, j)),
                pl.BlockSpec((1, tile_n), lambda i, j: (0, j)),
            ],
            out_specs=pl.BlockSpec((tile_b, tile_n), lambda i, j: (i, j)),
        ),
        compiler_params=pltpu.CompilerParams(
            dimension_semantics=("parallel", "parallel"),
            vmem_limit_bytes=vmem_limit,
        ),
    )(x, wt, b2)

    return y_pad[:B, :f_out]


def init_encoder_params(key, in_features, out_features):
    """Deterministic init matching PyTorch: Xavier-uniform W, U(-1/sqrt(fan_in)) bias."""
    kw, kb = jax.random.split(key)
    limit_w = math.sqrt(6.0 / (in_features + out_features))  # glorot_uniform
    weight = jax.random.uniform(
        kw, (out_features, in_features), jnp.float32, -limit_w, limit_w
    )
    limit_b = 1.0 / math.sqrt(in_features)
    bias = jax.random.uniform(kb, (out_features,), jnp.float32, -limit_b, limit_b)
    return weight, bias


if __name__ == "__main__":
    key = jax.random.PRNGKey(0)
    k_x, k_p = jax.random.split(key)

    B, F_IN, F_OUT = 8, 32, 16          # input_shape=32, model_cfg.layers_dims=[16]
    x = jax.random.normal(k_x, (B, F_IN), jnp.float32)
    weight, bias = init_encoder_params(k_p, F_IN, F_OUT)

    # one-time prep (transpose + lane-pad + bf16 cast) outside the forward
    wt, b2, f_out = prepare_encoder_params(weight, bias)

    y = encoder_forward(x, wt, b2, f_out=f_out)
    jax.block_until_ready(y)
    assert y.shape == (B, F_OUT)

    # reference with the same bf16 operands / f32 accumulation as the kernel
    y_ref_bf16 = (
        jnp.dot(x.astype(jnp.bfloat16), weight.T.astype(jnp.bfloat16),
                preferred_element_type=jnp.float32)
        + bias
    )
    assert jnp.allclose(y, y_ref_bf16, atol=1e-4, rtol=1e-4)

    # loose check against the full-f32 linear layer (bf16 rounding tolerance)
    y_ref_f32 = x @ weight.T + bias
    assert jnp.allclose(y, y_ref_f32, atol=5e-2, rtol=5e-2)

    print("KERNEL_OK")
</pallas_src>

<mosaic_0001>
module attributes {stable_mosaic.version = 11 : i64} {
  func.func @_linear_kernel(%arg0: i32, %arg1: i32, %arg2: memref<8x32xf32, #tpu.memory_space<vmem>>, %arg3: memref<32x128xbf16, #tpu.memory_space<vmem>>, %arg4: memref<1x128xf32, #tpu.memory_space<vmem>>, %arg5: memref<8x128xf32, #tpu.memory_space<vmem>>) attributes {dimension_semantics = [#tpu.dimension_semantics<parallel>, #tpu.dimension_semantics<parallel>], iteration_bounds = array<i64: 1, 1>, scalar_prefetch = 0 : i64, scratch_operands = 0 : i64, tpu.core_type = #tpu.core_type<tc>, window_params = [{transform_indices = @transform_0, window_bounds = array<i64: 8, 32>}, {transform_indices = @transform_1, window_bounds = array<i64: 32, 128>}, {transform_indices = @transform_2, window_bounds = array<i64: 1, 128>}, {transform_indices = @transform_3, window_bounds = array<i64: 8, 128>}]} {
    %c0 = arith.constant 0 : index
    %c0_0 = arith.constant 0 : index
    %0 = vector.load %arg2[%c0, %c0_0] : memref<8x32xf32, #tpu.memory_space<vmem>>, vector<8x32xf32>
    %1 = arith.truncf %0 : vector<8x32xf32> to vector<8x32xbf16>
    %c0_1 = arith.constant 0 : index
    %c0_2 = arith.constant 0 : index
    %2 = vector.load %arg3[%c0_1, %c0_2] : memref<32x128xbf16, #tpu.memory_space<vmem>>, vector<32x128xbf16>
    %cst = arith.constant dense<0.000000e+00> : vector<8x128xf32>
    %3 = tpu.matmul %1, %2, %cst {dimension_numbers = #tpu.dot_dimension_numbers<[1], [0], [0], [1], [0, 0, 1, 1], [], []>} : vector<8x32xbf16>, vector<32x128xbf16>, vector<8x128xf32> -> vector<8x128xf32>
    %c0_3 = arith.constant 0 : index
    %c0_4 = arith.constant 0 : index
    %4 = vector.load %arg4[%c0_3, %c0_4] : memref<1x128xf32, #tpu.memory_space<vmem>>, vector<1x128xf32>
    %5 = vector.broadcast %4 : vector<1x128xf32> to vector<8x128xf32>
    %6 = arith.addf %3, %5 : vector<8x128xf32>
    %c0_5 = arith.constant 0 : index
    %c0_6 = arith.constant 0 : index
    %7 = vector.load %arg5[%c0_5, %c0_6] : memref<8x128xf32, #tpu.memory_space<vmem>>, vector<8x128xf32>
    tpu.vector_store %arg5[%c0_5, %c0_6], %6 {strides = array<i32>} : memref<8x128xf32, #tpu.memory_space<vmem>>, vector<8x128xf32>,
    return
  }
  func.func @transform_0(%arg0: i32, %arg1: i32) -> (i32, i32) {
    %c0_i32 = arith.constant 0 : i32
    %c0_i32_0 = arith.constant 0 : i32
    return %arg0, %c0_i32 : i32, i32
  }
  func.func @transform_1(%arg0: i32, %arg1: i32) -> (i32, i32) {
    %c0_i32 = arith.constant 0 : i32
    %c0_i32_0 = arith.constant 0 : i32
    return %c0_i32, %arg1 : i32, i32
  }
  func.func @transform_2(%arg0: i32, %arg1: i32) -> (i32, i32) {
    %c0_i32 = arith.constant 0 : i32
    %c0_i32_0 = arith.constant 0 : i32
    return %c0_i32, %arg1 : i32, i32
  }
  func.func @transform_3(%arg0: i32, %arg1: i32) -> (i32, i32) {
    %c0_i32 = arith.constant 0 : i32
    return %arg0, %arg1 : i32, i32
  }
}

</mosaic_0001>

<bundles_post_ra>
// kernel: encoder_forward.1
= control target key start
LH: loop header
LB: loop body
LE: loop exit
PB: predicated region body
PF: predicated region fallthrough
CT: control target
= control target key end

     0   :  { %8 = vsyncpa [#allocation3], 0  ;;  %s257_s0 = inlined_call_operand.hbm [shape: f32[8,32], index: 0, kind: input, shape index: {}]   ;;  %s258_s1 = inlined_call_operand.hbm [shape: bf16[32,128], index: 1, kind: input, shape index: {}]   ;;  %s259_s2 = inlined_call_operand.vmem [shape: f32[1,128], index: 2, kind: input, shape index: {}]   ;;  %s260_s3 = inlined_call_operand.hbm [shape: f32[8,128], index: 3, kind: output, shape index: {}]  }
   0x1   :  { %9 = vsyncpa [#allocation6], 0 }
   0x2   :  { %10 = vsyncpa [#allocation4], 0  ;;  %s218_s12 = smov [#allocation2]   ;;  %s219_s14 = smov [#allocation5]  }
   0x3   :  { %s17_s13 = sshll.u32 %s218_s12, 4  ;;  %s26_s15 = sshll.u32 %s219_s14, 4  ;;  %s18_s13 = int_to_ptr.vmem [resolvable:$true] %s17_s13  ;;  %s27_s15 = int_to_ptr.vmem [resolvable:$true] %s26_s15 }
   0x4   :  { %s160_s16 = scalar_lea.vmem %s18_s13, 128  ;;  %p165_p1 = scmp.lt.s32.totalorder %s18_s13, %s18_s13 }
   0x5   :  { %p161_p0 = scmp.ne.s32.totalorder %s18_s13, %s160_s16  ;;  %p166_p2 = scmp.lt.s32.totalorder %s160_s16, %s160_s16 }
   0x7   :  { %p167_p3 = por %p166_p2, %p165_p1 }
   0x9   :  { %p168_p4 = pnand %p167_p3, %p161_p0 }
   0xb   :  { %171 = shalt.err (!%p168_p4)
}
   0xc   :  { %20 = dma.hbm_to_vmem [thread:$0]  %s257_s0, 128, %s18_s13, [#allocation3]  }
   0xd   :  { %s180_s19 = scalar_lea.vmem %s27_s15, 256  ;;  %p185_p6 = scmp.lt.s32.totalorder %s27_s15, %s27_s15 }
   0xe   :  { %p181_p5 = scmp.ne.s32.totalorder %s27_s15, %s180_s19  ;;  %p186_p7 = scmp.lt.s32.totalorder %s180_s19, %s180_s19 }
  0x10   :  { %p187_p8 = por %p186_p7, %p185_p6 }
  0x12   :  { %p188_p9 = pnand %p187_p8, %p181_p5 }
  0x14   :  { %191 = shalt.err (!%p188_p9)
}
  0x15   :  { %s220_s20 = smov 64   ;;  %s221_s21 = smov 4  }
  0x16   :  { %32 = dma.hbm_to_vmem [thread:$0]  %s258_s1, 256, %s27_s15, [#allocation6], %s220_s20, %s220_s20, %s221_s21  }
  0x17   :  { %212 = dma.done.wait [#allocation3], 128  }
  0x18   :  { %213 = vsyncadd [#allocation3], 4294967168 }
  0x19   :  { %214 = dma.done.wait [#allocation6], 256  }
  0x1a   :  { %215 = vsyncadd [#allocation6], 4294967040  ;;  %v222_v0 = vmov 0.0   ;;  %vm223_vm0 = vmmov 0   ;;  %v150_v1 = vld [vmem:[#allocation5 + $0x8] sm:$0xff]   ;;  %v151_v2 = vld [vmem:[#allocation5] sm:$0xff]  }
  0x1b   :  { %135 = vmatprep.subr.bf16.mxu0 %v222_v0  ;;  %139 = vmatprep.mubr.msk.bf16.mxu0 %vm223_vm0, %v222_v0  ;;  %v42_v3 = vld [vmem:[#allocation2] sm:$0xff]  ;;  %vm67_vm1 = vcmask 261120   ;;  %s224_s1 = smov [#allocation7]  }
  0x1c   :  { %136 = vmatpush3.bf16.msra.mxu0 %v150_v1  ;;  %v43_v4 = vpack.c.bf16 %v42_v3, %v42_v3  ;;  %v128_v5 = vld [vmem:[%s259_s2] ss:$0 sm:$0xff]  ;;  %s118_s25 = sshll.u32 %s224_s1, 4  ;;  %s119_s25 = int_to_ptr.vmem [resolvable:$true] %s118_s25 }
  0x1d   :  { %137 = vmatprep.subr.bf16.mxu0 %v222_v0  ;;  %s192_s26 = scalar_lea.vmem %s119_s25, 128  ;;  %p197_p11 = scmp.lt.s32.totalorder %s119_s25, %s119_s25 }
  0x1e   :  { %p193_p10 = scmp.ne.s32.totalorder %s119_s25, %s192_s26  ;;  %p198_p12 = scmp.lt.s32.totalorder %s192_s26, %s192_s26 }
  0x20   :  { %138 = vmatpush3.bf16.msra.mxu0 %v151_v2  ;;  %p199_p13 = por %p198_p12, %p197_p11 }
  0x22   :  { %p200_p0 = pnand %p199_p13, %p193_p10 }
  0x23   :  { %140 = vmatmul.mubr.msk.bf16.vlgmr.msra.gmra.mxu0 %vm67_vm1, %v43_v4 }
  0xe3   :  { %v105_v6 = vpop.f32.mrf.mxu0 }
  0xe4   :  { %v106_v7 = vadd.f32 %v128_v5, %v105_v6 }
  0xe5   :  { %v141_v8 = vpop.f32.mrf.mxu0 }
  0xe6   :  { %111 = vst [vmem:[#allocation7] sm:$0xff] %v106_v7 }
  0xe7   :  { %v108_v9 = vpop.f32.mrf.mxu0 }
  0xe8   :  { %203 = shalt.err (!%p200_p0)
}
  0xe9   :  { %121 = dma.vmem_to_hbm [thread:$0]  %s119_s25, 128, %s260_s3, [#allocation4]   ;;  %v142_v10 = vpop.f32.mrf.mxu0 }
  0xea   :  { %216 = dma.done.wait [#allocation4], 128  }
  0xeb   :  { %217 = vsyncadd [#allocation4], 4294967168 }
  0xec   :  { %125 = vsyncpa [#allocation3], 1 }
  0xed   :  { %126 = vsyncpa [#allocation6], 1 }
  0xee   :  { %127 = vsyncpa [#allocation4], 1 }

</bundles_post_ra>
